<compile_context>
chip_gen: v7x
topology: tpu7x:2x2x1
jax: 0.10.0
libtpu: 0.0.40
codegen_flags: <defaults>
</compile_context>

<pallas_src>
import jax
import jax.numpy as jnp
from jax.experimental import pallas as pl
from jax.experimental.pallas import tpu as pltpu

EPS = 1e-5
LANE = 128  # every feature dim is zero-padded to a full lane width


def _bn_train(h, gamma, beta):
    # BatchNorm1d training-mode semantics: biased variance over the batch axis.
    # Centered activation computed once; gamma folded into the rsqrt scale.
    mean = jnp.mean(h, axis=0, keepdims=True)
    c = h - mean
    var = jnp.mean(c * c, axis=0, keepdims=True)
    scale = jax.lax.rsqrt(var + EPS) * gamma          # (1, F)
    return c * scale + beta
    # TODO(synk): at large batch, compute sum(h) and sum(h*h) on the MXU
    # (e.g. ones(1,Ntile) @ h) instead of axis-0 VPU/XLU reductions, which
    # scale with N while the MXU idles between the three dependent matmuls.


def _make_kernel(in_units, mxu_dtype):
    def net_kernel(x_ref, w_ref, pv_ref, o_ref):
        # Single (8,128) f32 slab carries all seven small vectors: 1 DMA, 1 vreg.
        pv = pv_ref[...]
        b1, g1, be1 = pv[0:1, :], pv[1:2, :], pv[2:3, :]
        b2, g2, be2 = pv[3:4, :], pv[4:5, :], pv[5:6, :]
        b3 = pv[6:7, :]

        x = x_ref[...].astype(mxu_dtype)              # (N, in_units), unpadded

        # ---- layer 1: Linear -> ReLU -> BatchNorm1d ----
        # Only the real `in_units` rows of the padded (128,128) w1 are needed.
        h = jnp.dot(x, w_ref[0, :in_units, :],
                    preferred_element_type=jnp.float32) + b1
        h = jnp.maximum(h, 0.0)
        h = _bn_train(h, g1, be1)

        # ---- layer 2: Linear -> ReLU -> BatchNorm1d ----
        h = jnp.dot(h.astype(mxu_dtype), w_ref[1],
                    preferred_element_type=jnp.float32) + b2
        h = jnp.maximum(h, 0.0)
        h = _bn_train(h, g2, be2)

        # ---- layer 3: Linear (lane-dense (N,128) store -> unmasked vst) ----
        o_ref[...] = (jnp.dot(h.astype(mxu_dtype), w_ref[2],
                              preferred_element_type=jnp.float32) + b3)

    return net_kernel


def net_forward(x, w_slab, pv_slab, in_units, out_units,
                mxu_dtype=jnp.bfloat16):
    """x: (N, in_units) f32 (unpadded).
    w_slab: (3, 128, 128) in mxu_dtype (stacked, 128-padded w1/w2/w3).
    pv_slab: (8, 128) f32 packed [b1,g1,be1,b2,g2,be2,b3,0].
    Returns (N, out_units) f32."""
    n = x.shape[0]

    def vmem():
        return pl.BlockSpec(memory_space=pltpu.MemorySpace.VMEM)

    out_full = pl.pallas_call(
        _make_kernel(in_units, mxu_dtype),
        out_shape=jax.ShapeDtypeStruct((n, LANE), jnp.float32),
        in_specs=[vmem(), vmem(), vmem()],
        out_specs=vmem(),
    )(x, w_slab, pv_slab)

    # Slice the real output columns from the lane-dense slab.
    return out_full[:, :out_units]
    # TODO(synk): large-batch plan must be generation-aware: batch-only grid
    # marked "parallel" (2 TCs on v7x), resident weight/param slabs, two-pass
    # (or CMEM partial-sum) BN stats across batch tiles, VMEM budget re-derived
    # per chip (v7x 64 MiB phys / 32 MiB scoped default; v5e 16 MiB scoped
    # default), and packed/unpadded output writeback once HBM writeback of the
    # padded (N,128) slab dominates.


def init_params(key, in_units, hidden_units, out_units):
    """Unpadded params. Weights stored (in, out), U[-1/sqrt(fan_in), +],
    like nn.Linear; BN gamma=1, beta=0."""
    ks = jax.random.split(key, 6)

    def lin(kw, kb, fan_in, fan_out):
        bound = 1.0 / jnp.sqrt(float(fan_in))
        w = jax.random.uniform(kw, (fan_in, fan_out), jnp.float32, -bound, bound)
        b = jax.random.uniform(kb, (1, fan_out), jnp.float32, -bound, bound)
        return w, b

    w1, b1 = lin(ks[0], ks[1], in_units, hidden_units)
    w2, b2 = lin(ks[2], ks[3], hidden_units, hidden_units)
    w3, b3 = lin(ks[4], ks[5], hidden_units, out_units)
    return {
        "w1": w1, "b1": b1,
        "g1": jnp.ones((1, hidden_units), jnp.float32),
        "be1": jnp.zeros((1, hidden_units), jnp.float32),
        "w2": w2, "b2": b2,
        "g2": jnp.ones((1, hidden_units), jnp.float32),
        "be2": jnp.zeros((1, hidden_units), jnp.float32),
        "w3": w3, "b3": b3,
    }


def pack_weights(params, lane=LANE, dtype=jnp.bfloat16):
    """Zero-pad each (in,out) weight to (128,128) and stack -> one (3,128,128)
    slab (one DMA). Padded zeros are semantically inert."""
    def pad2(a):
        return jnp.pad(a, ((0, lane - a.shape[0]), (0, lane - a.shape[1])))

    return jnp.stack([pad2(params["w1"]),
                      pad2(params["w2"]),
                      pad2(params["w3"])], axis=0).astype(dtype)


def pack_vectors(params, lane=LANE):
    """Pack b1,g1,be1,b2,g2,be2,b3 (each 128-lane zero-padded) into one
    (8,128) f32 slab: exactly one vreg, one DMA. Padded gamma/beta are 0 so
    padded columns stay exactly 0 through BN."""
    def row(v):
        return jnp.pad(v, ((0, 0), (0, lane - v.shape[1])))

    return jnp.concatenate(
        [row(params["b1"]), row(params["g1"]), row(params["be1"]),
         row(params["b2"]), row(params["g2"]), row(params["be2"]),
         row(params["b3"]), jnp.zeros((1, lane), jnp.float32)],
        axis=0).astype(jnp.float32)


def reference_forward(x, p, mxu_dtype=jnp.float32):
    """Pure-JAX reference (unpadded). mxu_dtype mirrors the kernel's matmul
    operand dtype so each kernel mode is checked against matched math."""
    def dot(a, w):
        return jnp.dot(a.astype(mxu_dtype), w.astype(mxu_dtype),
                       preferred_element_type=jnp.float32)

    def bn(h, g, be):
        m = jnp.mean(h, axis=0, keepdims=True)
        v = jnp.mean((h - m) ** 2, axis=0, keepdims=True)
        return (h - m) * jax.lax.rsqrt(v + EPS) * g + be

    h = jnp.maximum(dot(x, p["w1"]) + p["b1"], 0.0)
    h = bn(h, p["g1"], p["be1"])
    h = jnp.maximum(dot(h, p["w2"]) + p["b2"], 0.0)
    h = bn(h, p["g2"], p["be2"])
    return dot(h, p["w3"]) + p["b3"]


if __name__ == "__main__":
    # Small shapes consistent with the MLP: batch=8, in=16, hidden=32, out=4.
    # TODO(synk): PyTorch training-mode BatchNorm1d also updates
    # running_mean/running_var with momentum; only the forward output is
    # produced here (it does not depend on the running stats).
    N, IN_UNITS, HIDDEN, OUT = 8, 16, 32, 4

    key = jax.random.PRNGKey(0)
    k_x, k_p = jax.random.split(key)
    x = jax.random.normal(k_x, (N, IN_UNITS), jnp.float32)

    params = init_params(k_p, IN_UNITS, HIDDEN, OUT)
    pv_slab = pack_vectors(params)
    w_f32 = pack_weights(params, dtype=jnp.float32)
    w_bf16 = pack_weights(params, dtype=jnp.bfloat16)

    # Exact PyTorch-forward parity path (f32 MXU operands).
    out_f32 = jax.block_until_ready(
        net_forward(x, w_f32, pv_slab, IN_UNITS, OUT, mxu_dtype=jnp.float32))
    ref_f32 = reference_forward(x, params, mxu_dtype=jnp.float32)
    assert out_f32.shape == (N, OUT)
    assert jnp.allclose(out_f32, ref_f32, atol=1e-4, rtol=1e-4), \
        "f32 kernel mismatch vs reference"

    # Optimized path (v6e/v7x): bf16 MXU operands, f32 accumulate + f32 BN.
    out_bf16 = jax.block_until_ready(
        net_forward(x, w_bf16, pv_slab, IN_UNITS, OUT, mxu_dtype=jnp.bfloat16))
    ref_bf16 = reference_forward(x, params, mxu_dtype=jnp.bfloat16)
    assert out_bf16.shape == (N, OUT)
    assert jnp.allclose(out_bf16, ref_bf16, atol=1e-3, rtol=1e-3), \
        "bf16 kernel mismatch vs bf16-matched reference"

    print("KERNEL_OK")
</pallas_src>

<mosaic_0001>
module attributes {stable_mosaic.version = 11 : i64} {
  func.func @net_kernel(%arg0: memref<8x16xf32, #tpu.memory_space<vmem>>, %arg1: memref<3x128x128xf32, #tpu.memory_space<vmem>>, %arg2: memref<8x128xf32, #tpu.memory_space<vmem>>, %arg3: memref<8x128xf32, #tpu.memory_space<vmem>>) attributes {dimension_semantics = [], scalar_prefetch = 0 : i64, scratch_operands = 0 : i64, tpu.core_type = #tpu.core_type<tc>} {
    %c0 = arith.constant 0 : index
    %c0_0 = arith.constant 0 : index
    %0 = vector.load %arg2[%c0, %c0_0] : memref<8x128xf32, #tpu.memory_space<vmem>>, vector<8x128xf32>
    %1 = vector.extract_strided_slice %0 {offsets = [0, 0], sizes = [1, 128], strides = [1, 1]} : vector<8x128xf32> to vector<1x128xf32>
    %2 = vector.extract_strided_slice %0 {offsets = [1, 0], sizes = [1, 128], strides = [1, 1]} : vector<8x128xf32> to vector<1x128xf32>
    %3 = vector.extract_strided_slice %0 {offsets = [2, 0], sizes = [1, 128], strides = [1, 1]} : vector<8x128xf32> to vector<1x128xf32>
    %4 = vector.extract_strided_slice %0 {offsets = [3, 0], sizes = [1, 128], strides = [1, 1]} : vector<8x128xf32> to vector<1x128xf32>
    %5 = vector.extract_strided_slice %0 {offsets = [4, 0], sizes = [1, 128], strides = [1, 1]} : vector<8x128xf32> to vector<1x128xf32>
    %6 = vector.extract_strided_slice %0 {offsets = [5, 0], sizes = [1, 128], strides = [1, 1]} : vector<8x128xf32> to vector<1x128xf32>
    %7 = vector.extract_strided_slice %0 {offsets = [6, 0], sizes = [1, 128], strides = [1, 1]} : vector<8x128xf32> to vector<1x128xf32>
    %c0_1 = arith.constant 0 : index
    %c0_2 = arith.constant 0 : index
    %8 = vector.load %arg0[%c0_1, %c0_2] : memref<8x16xf32, #tpu.memory_space<vmem>>, vector<8x16xf32>
    %c0_3 = arith.constant 0 : index
    %c0_4 = arith.constant 0 : index
    %c0_5 = arith.constant 0 : index
    %9 = vector.load %arg1[%c0_3, %c0_4, %c0_5] : memref<3x128x128xf32, #tpu.memory_space<vmem>>, vector<1x16x128xf32>
    %10 = vector.shape_cast %9 : vector<1x16x128xf32> to vector<16x128xf32>
    %cst = arith.constant dense<0.000000e+00> : vector<8x128xf32>
    %11 = tpu.matmul %8, %10, %cst {dimension_numbers = #tpu.dot_dimension_numbers<[1], [0], [0], [1], [0, 0, 1, 1], [], []>} : vector<8x16xf32>, vector<16x128xf32>, vector<8x128xf32> -> vector<8x128xf32>
    %12 = vector.broadcast %1 : vector<1x128xf32> to vector<8x128xf32>
    %13 = arith.addf %11, %12 : vector<8x128xf32>
    %cst_6 = arith.constant 0.000000e+00 : f32
    %14 = vector.broadcast %cst_6 : f32 to vector<8x128xf32>
    %15 = arith.maximumf %13, %14 : vector<8x128xf32>
    %cst_7 = arith.constant dense<0.000000e+00> : vector<128xf32>
    %16 = vector.multi_reduction <add>, %15, %cst_7 [0] : vector<8x128xf32> to vector<128xf32>
    %17 = vector.shape_cast %16 : vector<128xf32> to vector<1x128xf32>
    %cst_8 = arith.constant 8.000000e+00 : f32
    %18 = vector.broadcast %cst_8 : f32 to vector<1x128xf32>
    %19 = arith.divf %17, %18 : vector<1x128xf32>
    %20 = vector.broadcast %19 : vector<1x128xf32> to vector<8x128xf32>
    %21 = arith.subf %15, %20 : vector<8x128xf32>
    %22 = arith.mulf %21, %21 : vector<8x128xf32>
    %cst_9 = arith.constant dense<0.000000e+00> : vector<128xf32>
    %23 = vector.multi_reduction <add>, %22, %cst_9 [0] : vector<8x128xf32> to vector<128xf32>
    %24 = vector.shape_cast %23 : vector<128xf32> to vector<1x128xf32>
    %cst_10 = arith.constant 8.000000e+00 : f32
    %25 = vector.broadcast %cst_10 : f32 to vector<1x128xf32>
    %26 = arith.divf %24, %25 : vector<1x128xf32>
    %cst_11 = arith.constant 9.99999974E-6 : f32
    %27 = vector.broadcast %cst_11 : f32 to vector<1x128xf32>
    %28 = arith.addf %26, %27 : vector<1x128xf32>
    %29 = math.rsqrt %28 : vector<1x128xf32>
    %30 = arith.mulf %29, %2 : vector<1x128xf32>
    %31 = vector.broadcast %30 : vector<1x128xf32> to vector<8x128xf32>
    %32 = arith.mulf %21, %31 : vector<8x128xf32>
    %33 = vector.broadcast %3 : vector<1x128xf32> to vector<8x128xf32>
    %34 = arith.addf %32, %33 : vector<8x128xf32>
    %c1 = arith.constant 1 : index
    %c0_12 = arith.constant 0 : index
    %c0_13 = arith.constant 0 : index
    %35 = vector.load %arg1[%c1, %c0_12, %c0_13] : memref<3x128x128xf32, #tpu.memory_space<vmem>>, vector<1x128x128xf32>
    %36 = vector.shape_cast %35 : vector<1x128x128xf32> to vector<128x128xf32>
    %cst_14 = arith.constant dense<0.000000e+00> : vector<8x128xf32>
    %37 = tpu.matmul %34, %36, %cst_14 {dimension_numbers = #tpu.dot_dimension_numbers<[1], [0], [0], [1], [0, 0, 1, 1], [], []>} : vector<8x128xf32>, vector<128x128xf32>, vector<8x128xf32> -> vector<8x128xf32>
    %38 = vector.broadcast %4 : vector<1x128xf32> to vector<8x128xf32>
    %39 = arith.addf %37, %38 : vector<8x128xf32>
    %cst_15 = arith.constant 0.000000e+00 : f32
    %40 = vector.broadcast %cst_15 : f32 to vector<8x128xf32>
    %41 = arith.maximumf %39, %40 : vector<8x128xf32>
    %cst_16 = arith.constant dense<0.000000e+00> : vector<128xf32>
    %42 = vector.multi_reduction <add>, %41, %cst_16 [0] : vector<8x128xf32> to vector<128xf32>
    %43 = vector.shape_cast %42 : vector<128xf32> to vector<1x128xf32>
    %cst_17 = arith.constant 8.000000e+00 : f32
    %44 = vector.broadcast %cst_17 : f32 to vector<1x128xf32>
    %45 = arith.divf %43, %44 : vector<1x128xf32>
    %46 = vector.broadcast %45 : vector<1x128xf32> to vector<8x128xf32>
    %47 = arith.subf %41, %46 : vector<8x128xf32>
    %48 = arith.mulf %47, %47 : vector<8x128xf32>
    %cst_18 = arith.constant dense<0.000000e+00> : vector<128xf32>
    %49 = vector.multi_reduction <add>, %48, %cst_18 [0] : vector<8x128xf32> to vector<128xf32>
    %50 = vector.shape_cast %49 : vector<128xf32> to vector<1x128xf32>
    %cst_19 = arith.constant 8.000000e+00 : f32
    %51 = vector.broadcast %cst_19 : f32 to vector<1x128xf32>
    %52 = arith.divf %50, %51 : vector<1x128xf32>
    %cst_20 = arith.constant 9.99999974E-6 : f32
    %53 = vector.broadcast %cst_20 : f32 to vector<1x128xf32>
    %54 = arith.addf %52, %53 : vector<1x128xf32>
    %55 = math.rsqrt %54 : vector<1x128xf32>
    %56 = arith.mulf %55, %5 : vector<1x128xf32>
    %57 = vector.broadcast %56 : vector<1x128xf32> to vector<8x128xf32>
    %58 = arith.mulf %47, %57 : vector<8x128xf32>
    %59 = vector.broadcast %6 : vector<1x128xf32> to vector<8x128xf32>
    %60 = arith.addf %58, %59 : vector<8x128xf32>
    %c2 = arith.constant 2 : index
    %c0_21 = arith.constant 0 : index
    %c0_22 = arith.constant 0 : index
    %61 = vector.load %arg1[%c2, %c0_21, %c0_22] : memref<3x128x128xf32, #tpu.memory_space<vmem>>, vector<1x128x128xf32>
    %62 = vector.shape_cast %61 : vector<1x128x128xf32> to vector<128x128xf32>
    %cst_23 = arith.constant dense<0.000000e+00> : vector<8x128xf32>
    %63 = tpu.matmul %60, %62, %cst_23 {dimension_numbers = #tpu.dot_dimension_numbers<[1], [0], [0], [1], [0, 0, 1, 1], [], []>} : vector<8x128xf32>, vector<128x128xf32>, vector<8x128xf32> -> vector<8x128xf32>
    %64 = vector.broadcast %7 : vector<1x128xf32> to vector<8x128xf32>
    %65 = arith.addf %63, %64 : vector<8x128xf32>
    %c0_24 = arith.constant 0 : index
    %c0_25 = arith.constant 0 : index
    %66 = vector.load %arg3[%c0_24, %c0_25] : memref<8x128xf32, #tpu.memory_space<vmem>>, vector<8x128xf32>
    tpu.vector_store %arg3[%c0_24, %c0_25], %65 {strides = array<i32>} : memref<8x128xf32, #tpu.memory_space<vmem>>, vector<8x128xf32>,
    return
  }
}

</mosaic_0001>

<bundles_post_ra>
// kernel: tpu_custom_call.1
= control target key start
LH: loop header
LB: loop body
LE: loop exit
PB: predicated region body
PF: predicated region fallthrough
CT: control target
= control target key end

     0   :  { %8 = vsyncpa [#allocation3], 0  ;;  %s779_s0 = inlined_call_operand.hbm [shape: f32[8,16], index: 0, kind: input, shape index: {}]   ;;  %s780_s1 = inlined_call_operand.hbm [shape: f32[3,128,128], index: 1, kind: input, shape index: {}]   ;;  %s781_s2 = inlined_call_operand.hbm [shape: f32[8,128], index: 2, kind: input, shape index: {}]   ;;  %s782_s3 = inlined_call_operand.hbm [shape: f32[8,128], index: 3, kind: output, shape index: {}]  }
   0x1   :  { %9 = vsyncpa [#allocation6], 0 }
   0x2   :  { %10 = vsyncpa [#allocation4], 0  ;;  %s667_s12 = smov [#allocation5]   ;;  %s573_s16 = scalar_lea.hbm %s780_s1, 6144 }
   0x3   :  { %s26_s13 = sshll.u32 %s667_s12, 4  ;;  %p574_p0 = scmp.ne.s32.totalorder %s780_s1, %s573_s16  ;;  %s27_s13 = int_to_ptr.vmem [resolvable:$true] %s26_s13 }
   0x4   :  { %p577_p1 = scmp.lt.u32.totalorder %s573_s16, %s780_s1 }
   0x6   :  { %p579_p2 = pnand %p577_p1, %p574_p0 }
   0x8   :  { %582 = shalt.err (!%p579_p2)
}
   0x9   :  { %s583_s21 = scalar_lea.vmem %s27_s13, 6144  ;;  %p588_p4 = scmp.lt.s32.totalorder %s27_s13, %s27_s13 }
   0xa   :  { %p584_p3 = scmp.ne.s32.totalorder %s27_s13, %s583_s21  ;;  %p589_p5 = scmp.lt.s32.totalorder %s583_s21, %s583_s21 }
   0xc   :  { %p590_p6 = por %p589_p5, %p588_p4 }
   0xe   :  { %p591_p7 = pnand %p590_p6, %p584_p3 }
  0x10   :  { %594 = shalt.err (!%p591_p7)
}
  0x11   :  { %s668_s22 = smov 128   ;;  %s669_s23 = smov 8  }
  0x12   :  { %32 = dma.hbm_to_vmem [thread:$0]  %s780_s1, 6144, %s27_s13, [#allocation6], %s668_s22, %s668_s22, %s669_s23  }
  0x13   :  { %s670_s26 = smov [#allocation2]   ;;  %s671_s28 = smov [#allocation7]  }
  0x14   :  { %s17_s27 = sshll.u32 %s670_s26, 4  ;;  %s39_s29 = sshll.u32 %s671_s28, 4  ;;  %s18_s27 = int_to_ptr.vmem [resolvable:$true] %s17_s27  ;;  %s40_s29 = int_to_ptr.vmem [resolvable:$true] %s39_s29 }
  0x15   :  { %s595_s5 = scalar_lea.hbm %s779_s0, 128 }
  0x16   :  { %p596_p8 = scmp.ne.s32.totalorder %s779_s0, %s595_s5  ;;  %p599_p9 = scmp.lt.u32.totalorder %s595_s5, %s779_s0 }
  0x18   :  { %p601_p10 = pnand %p599_p9, %p596_p8 }
  0x1a   :  { %604 = shalt.err (!%p601_p10)
}
  0x1b   :  { %s605_s1 = scalar_lea.vmem %s18_s27, 128  ;;  %p610_p12 = scmp.lt.s32.totalorder %s18_s27, %s18_s27 }
  0x1c   :  { %p606_p11 = scmp.ne.s32.totalorder %s18_s27, %s605_s1  ;;  %p611_p13 = scmp.lt.s32.totalorder %s605_s1, %s605_s1 }
  0x1e   :  { %p612_p0 = por %p611_p13, %p610_p12 }
  0x20   :  { %p613_p1 = pnand %p612_p0, %p606_p11 }
  0x22   :  { %616 = shalt.err (!%p613_p1)
}
  0x23   :  { %20 = dma.hbm_to_vmem [thread:$0]  %s779_s0, 128, %s18_s27, [#allocation3]  }
  0x24   :  { %s617_s14 = scalar_lea.hbm %s781_s2, 128 }
  0x25   :  { %p618_p2 = scmp.ne.s32.totalorder %s781_s2, %s617_s14  ;;  %p621_p3 = scmp.lt.u32.totalorder %s617_s14, %s781_s2 }
  0x27   :  { %p623_p4 = pnand %p621_p3, %p618_p2 }
  0x29   :  { %626 = shalt.err (!%p623_p4)
}
  0x2a   :  { %s627_s19 = scalar_lea.vmem %s40_s29, 128  ;;  %p632_p6 = scmp.lt.s32.totalorder %s40_s29, %s40_s29 }
  0x2b   :  { %p628_p5 = scmp.ne.s32.totalorder %s40_s29, %s627_s19  ;;  %p633_p7 = scmp.lt.s32.totalorder %s627_s19, %s627_s19 }
  0x2d   :  { %p634_p8 = por %p633_p7, %p632_p6 }
  0x2f   :  { %p635_p9 = pnand %p634_p8, %p628_p5 }
  0x31   :  { %638 = shalt.err (!%p635_p9)
}
  0x32   :  { %42 = dma.hbm_to_vmem [thread:$0]  %s781_s2, 128, %s40_s29, [#allocation6]  }
  0x33   :  { %661 = dma.done.wait [#allocation3], 128  }
  0x34   :  { %662 = vsyncadd [#allocation3], 4294967168 }
  0x35   :  { %663 = dma.done.wait [#allocation6], 6272  }
  0x36   :  { %664 = vsyncadd [#allocation6], 4294961024  ;;  %v672_v0 = vmov 0.0|0.0   ;;  %vm673_vm0 = vmmov 0   ;;  %v674_v1 = vmov 0.0   ;;  %v54_v2 = vld [vmem:[#allocation5] sm:$0xff]  ;;  %v56_v30 = vlaneseq }
  0x37   :  { %509 = vmatprep.subr.bf16.mxu0 %v672_v0  ;;  %436 = vmatprep.mubr.msk.f32.mxu0 %vm673_vm0, %v674_v1  ;;  %v55_v3 = vld [vmem:[#allocation5 + $0x8] sm:$0xff]  ;;  %v53_v5 = vld [vmem:[#allocation2] sm:$0xff]  ;;  %vm60_vm1 = vcmask 130048   ;;  %v166_v6 = vld [vmem:[#allocation5 + $0x80] sm:$0xff]  ;;  %s675_s2 = smov [#allocation8]  }
  0x38   :  { %512 = vmatprep.subr.bf16.mxu1 %v672_v0  ;;  %471 = vmatprep.mubr.msk.f32.mxu1 %vm673_vm0, %v674_v1  ;;  %v510_v4 = vpack.c.bf16 %v55_v3, %v54_v2  ;;  %v167_v7 = vld [vmem:[#allocation5 + $0x88] sm:$0xff]  ;;  %v168_v9 = vld [vmem:[#allocation5 + $0x90] sm:$0xff]  ;;  %v169_v10 = vld [vmem:[#allocation5 + $0x98] sm:$0xff]  ;;  %v742_v31 = vshrl.u32 %v56_v30, 7  ;;  %s384_s21 = sshll.u32 %s675_s2, 4  ;;  %s385_s21 = int_to_ptr.vmem [resolvable:$true] %s384_s21 }
  0x39   :  { %v513_v8 = vpack.c.bf16 %v167_v7, %v166_v6  ;;  %v516_v11 = vpack.c.bf16 %v169_v10, %v168_v9  ;;  %v170_v12 = vld [vmem:[#allocation5 + $0xa0] sm:$0xff]  ;;  %v171_v13 = vld [vmem:[#allocation5 + $0xa8] sm:$0xff]  ;;  %v172_v15 = vld [vmem:[#allocation5 + $0xb0] sm:$0xff]  ;;  %s639_s22 = scalar_lea.vmem %s385_s21, 128  ;;  %p644_p11 = scmp.lt.s32.totalorder %s385_s21, %s385_s21 }
  0x3a   :  { %511 = vmatpush3.bf16.msra.mxu0 %v510_v4  ;;  %v519_v14 = vpack.c.bf16 %v171_v13, %v170_v12  ;;  %v173_v16 = vld [vmem:[#allocation5 + $0xb8] sm:$0xff]  ;;  %v174_v18 = vld [vmem:[#allocation5 + $0xc0] sm:$0xff]  ;;  %v175_v19 = vld [vmem:[#allocation5 + $0xc8] sm:$0xff]  ;;  %v58_v32 = vsub.s32 0, %v742_v31  ;;  %v157_v56 = vsub.s32 1, %v742_v31  ;;  %v162_v57 = vsub.s32 2, %v742_v31  ;;  %p640_p10 = scmp.ne.s32.totalorder %s385_s21, %s639_s22  ;;  %p645_p12 = scmp.lt.s32.totalorder %s639_s22, %s639_s22 }
  0x3b   :  { %536 = vmatprep.subr.bf16.mxu0 %v672_v0  ;;  %514 = vmatpush3.bf16.msra.mxu1 %v513_v8  ;;  %v522_v17 = vpack.c.bf16 %v173_v16, %v172_v15  ;;  %v525_v20 = vpack.c.bf16 %v175_v19, %v174_v18  ;;  %v176_v21 = vld [vmem:[#allocation5 + $0xd0] sm:$0xff]  ;;  %v177_v22 = vld [vmem:[#allocation5 + $0xd8] sm:$0xff]  ;;  %v178_v24 = vld [vmem:[#allocation5 + $0xe0] sm:$0xff] }
  0x3c   :  { %515 = vmatprep.subr.bf16.mxu1 %v672_v0  ;;  %v528_v23 = vpack.c.bf16 %v177_v22, %v176_v21  ;;  %v179_v25 = vld [vmem:[#allocation5 + $0xe8] sm:$0xff]  ;;  %v180_v27 = vld [vmem:[#allocation5 + $0xf0] sm:$0xff]  ;;  %v181_v28 = vld [vmem:[#allocation5 + $0xf8] sm:$0xff]  ;;  %p646_p13 = por %p645_p12, %p644_p11 }
  0x3d   :  { %437 = vmatmul.mubr.msk.f32.vlgmr.msra.gmra.mrb[0].mxu0 %vm60_vm1, %v53_v5  ;;  %v531_v26 = vpack.c.bf16 %v179_v25, %v178_v24  ;;  %v534_v29 = vpack.c.bf16 %v181_v28, %v180_v27  ;;  %v745_v33 = vld [vmem:[#allocation7] sm:$0xff]  ;;  %v288_v2 = vld [vmem:[#allocation5 + $0x108] sm:$0xff]  ;;  %v289_v4 = vld [vmem:[#allocation5 + $0x110] sm:$0xff]  ;;  %v184_v25 = vsub.s32 3, %v742_v31 }
  0x3e   :  { %506 = vmatprep.mubr.msk.f32.mxu0 %vm673_vm0, %v674_v1  ;;  %v59_v34 = vrot.slane %v745_v33, %v58_v32  ;;  %v163_v61 = vrot.slane %v745_v33, %v162_v57  ;;  %v287_v1 = vld [vmem:[#allocation5 + $0x100] sm:$0xff]  ;;  %v290_v5 = vld [vmem:[#allocation5 + $0x118] sm:$0xff]  ;;  %v292_v8 = vld [vmem:[#allocation5 + $0x128] sm:$0xff]  ;;  %v305_v57 = vsub.s32 6, %v742_v31  ;;  %p647_p0 = pnand %p646_p13, %p640_p10 }
  0x3f   :  { %517 = vmatpush3.bf16.msra.mxu1 %v516_v11  ;;  %v537_v3 = vpack.c.bf16 %v288_v2, %v287_v1  ;;  %v540_v6 = vpack.c.bf16 %v290_v5, %v289_v4  ;;  %v291_v7 = vld [vmem:[#allocation5 + $0x120] sm:$0xff]  ;;  %v293_v10 = vld [vmem:[#allocation5 + $0x130] sm:$0xff]  ;;  %v294_v11 = vld [vmem:[#allocation5 + $0x138] sm:$0xff] }
  0x40   :  { %518 = vmatprep.subr.bf16.mxu1 %v672_v0  ;;  %v543_v9 = vpack.c.bf16 %v292_v8, %v291_v7  ;;  %v546_v12 = vpack.c.bf16 %v294_v11, %v293_v10  ;;  %v295_v13 = vld [vmem:[#allocation5 + $0x140] sm:$0xff]  ;;  %v297_v16 = vld [vmem:[#allocation5 + $0x150] sm:$0xff] }
  0x41   :  { %538 = vmatpush3.bf16.msra.mxu0 %v537_v3  ;;  %v299_v19 = vld [vmem:[#allocation5 + $0x160] sm:$0xff]  ;;  %v301_v22 = vld [vmem:[#allocation5 + $0x170] sm:$0xff] }
  0x42   :  { %539 = vmatprep.subr.bf16.mxu0 %v672_v0 }
  0x43   :  { %520 = vmatpush3.bf16.msra.mxu1 %v519_v14  ;;  %v296_v14 = vld [vmem:[#allocation5 + $0x148] sm:$0xff] }
  0x44   :  { %521 = vmatprep.subr.bf16.mxu1 %v672_v0  ;;  %v549_v15 = vpack.c.bf16 %v296_v14, %v295_v13 }
  0x45   :  { %541 = vmatpush3.bf16.msra.mxu0 %v540_v6 }
  0x46   :  { %542 = vmatprep.subr.bf16.mxu0 %v672_v0 }
  0x47   :  { %523 = vmatpush3.bf16.msra.mxu1 %v522_v17  ;;  %v298_v17 = vld [vmem:[#allocation5 + $0x158] sm:$0xff] }
  0x48   :  { %524 = vmatprep.subr.bf16.mxu1 %v672_v0  ;;  %v552_v18 = vpack.c.bf16 %v298_v17, %v297_v16 }
  0x49   :  { %544 = vmatpush3.bf16.msra.mxu0 %v543_v9 }
  0x4a   :  { %545 = vmatprep.subr.bf16.mxu0 %v672_v0 }
  0x4b   :  { %526 = vmatpush3.bf16.msra.mxu1 %v525_v20  ;;  %v300_v20 = vld [vmem:[#allocation5 + $0x168] sm:$0xff] }
  0x4c   :  { %527 = vmatprep.subr.bf16.mxu1 %v672_v0  ;;  %v555_v21 = vpack.c.bf16 %v300_v20, %v299_v19 }
  0x4d   :  { %547 = vmatpush3.bf16.msra.mxu0 %v546_v12 }
  0x4e   :  { %548 = vmatprep.subr.bf16.mxu0 %v672_v0 }
  0x4f   :  { %529 = vmatpush3.bf16.msra.mxu1 %v528_v23  ;;  %v302_v23 = vld [vmem:[#allocation5 + $0x178] sm:$0xff] }
  0x50   :  { %530 = vmatprep.subr.bf16.mxu1 %v672_v0  ;;  %v558_v24 = vpack.c.bf16 %v302_v23, %v301_v22 }
  0x51   :  { %550 = vmatpush3.bf16.msra.mxu0 %v549_v15 }
  0x52   :  { %551 = vmatprep.subr.bf16.mxu0 %v672_v0 }
  0x53   :  { %532 = vmatpush3.bf16.msra.mxu1 %v531_v26  ;;  %v185_v26 = vrot.slane %v745_v33, %v184_v25 }
  0x54   :  { %533 = vmatprep.subr.bf16.mxu1 %v672_v0 }
  0x55   :  { %553 = vmatpush3.bf16.msra.mxu0 %v552_v18 }
  0x56   :  { %554 = vmatprep.subr.bf16.mxu0 %v672_v0 }
  0x57   :  { %535 = vmatpush3.bf16.msra.mxu1 %v534_v29 }
  0x59   :  { %556 = vmatpush3.bf16.msra.mxu0 %v555_v21 }
  0x5a   :  { %557 = vmatprep.subr.bf16.mxu0 %v672_v0 }
  0x5d   :  { %559 = vmatpush3.bf16.msra.mxu0 %v558_v24 }
 0x110   :  { %v130_v35 = vpop.f32.mrb[0].mxu0 }
 0x111   :  { %v131_v36 = vadd.f32 %v130_v35, %v59_v34  ;;  %v438_v37 = vpop.f32.mrb[1].mxu0 }
 0x113   :  { %v134_v38 = vmax.f32 %v131_v36, 0.0 }
 0x115   :  { %v135_v39 = vrot.slane %v134_v38, 4 }
 0x117   :  { %v136_v40 = vadd.f32 %v135_v39, %v134_v38 }
 0x119   :  { %v137_v41 = vrot.slane %v136_v40, 2 }
 0x11b   :  { %v138_v42 = vadd.f32 %v137_v41, %v136_v40 }
 0x11d   :  { %v139_v43 = vrot.slane %v138_v42, 1 }
 0x11f   :  { %v140_v44 = vadd.f32 %v139_v43, %v138_v42 }
 0x121   :  { %v142_v45 = vmul.f32 0.125, %v140_v44 }
 0x123   :  { %v143_v46 = vsub.f32 %v134_v38, %v142_v45 }
 0x125   :  { %v144_v47 = vmul.f32 %v143_v46, %v143_v46 }
 0x127   :  { %v145_v48 = vrot.slane %v144_v47, 4 }
 0x129   :  { %v146_v49 = vadd.f32 %v145_v48, %v144_v47 }
 0x12b   :  { %v147_v50 = vrot.slane %v146_v49, 2 }
 0x12d   :  { %v148_v51 = vadd.f32 %v147_v50, %v146_v49  ;;  %v278_v49 = vsub.s32 4, %v742_v31  ;;  %v283_v50 = vsub.s32 5, %v742_v31 }
 0x12f   :  { %v149_v52 = vrot.slane %v148_v51, 1 }
 0x131   :  { %v150_v53 = vadd.f32 %v149_v52, %v148_v51 }
 0x133   :  { %v151_v54 = vmul.f32 0.125, %v150_v53 }
 0x135   :  { %v152_v55 = vadd.f32 1e-05, %v151_v54  ;;  %v284_v54 = vrot.slane %v745_v33, %v283_v50 }
 0x137   :  { %569 = vrsqrt.f32 %v152_v55 }
 0x141   :  { %v570_v58 = vpop.eup %569 }
 0x142   :  { %v154_v59 = vmul.f32 %v570_v58, %v745_v33  ;;  %v306_v58 = vrot.slane %v745_v33, %v305_v57 }
 0x144   :  { %v158_v60 = vrot.slane %v154_v59, %v157_v56 }
 0x146   :  { %v159_v62 = vmul.f32 %v158_v60, %v143_v46 }
 0x148   :  { %v164_v63 = vadd.f32 %v163_v61, %v159_v62 }
 0x14a   :  { %472 = vmatmul.mubr.f32.vlgmr.msra.gmra.mrb[0].mxu1 %v164_v63 }
 0x21d   :  { %v252_v27 = vpop.f32.mrb[0].mxu1 }
 0x21e   :  { %v253_v28 = vadd.f32 %v252_v27, %v185_v26  ;;  %v473_v29 = vpop.f32.mrb[1].mxu1 }
 0x220   :  { %v256_v30 = vmax.f32 %v253_v28, 0.0 }
 0x222   :  { %v257_v32 = vrot.slane %v256_v30, 4 }
 0x224   :  { %v258_v34 = vadd.f32 %v257_v32, %v256_v30 }
 0x226   :  { %v259_v35 = vrot.slane %v258_v34, 2 }
 0x228   :  { %v260_v36 = vadd.f32 %v259_v35, %v258_v34 }
 0x22a   :  { %v261_v37 = vrot.slane %v260_v36, 1 }
 0x22c   :  { %v262_v38 = vadd.f32 %v261_v37, %v260_v36 }
 0x22e   :  { %v263_v39 = vmul.f32 0.125, %v262_v38 }
 0x230   :  { %v264_v0 = vsub.f32 %v256_v30, %v263_v39 }
 0x232   :  { %v265_v40 = vmul.f32 %v264_v0, %v264_v0 }
 0x234   :  { %v266_v41 = vrot.slane %v265_v40, 4 }
 0x236   :  { %v267_v42 = vadd.f32 %v266_v41, %v265_v40 }
 0x238   :  { %v268_v43 = vrot.slane %v267_v42, 2 }
 0x23a   :  { %v269_v44 = vadd.f32 %v268_v43, %v267_v42 }
 0x23c   :  { %v270_v45 = vrot.slane %v269_v44, 1 }
 0x23e   :  { %v271_v46 = vadd.f32 %v270_v45, %v269_v44 }
 0x240   :  { %v272_v47 = vmul.f32 0.125, %v271_v46 }
 0x242   :  { %v273_v48 = vadd.f32 1e-05, %v272_v47 }
 0x244   :  { %571 = vrsqrt.f32 %v273_v48 }
 0x24e   :  { %v572_v51 = vpop.eup %571 }
 0x24f   :  { %v275_v52 = vmul.f32 %v572_v51, %v745_v33 }
 0x251   :  { %v279_v53 = vrot.slane %v275_v52, %v278_v49 }
 0x253   :  { %v280_v55 = vmul.f32 %v279_v53, %v264_v0 }
 0x255   :  { %v285_v56 = vadd.f32 %v284_v54, %v280_v55 }
 0x257   :  { %507 = vmatmul.mubr.f32.vlgmr.msra.gmra.mrb[2].mxu0 %v285_v56 }
 0x32a   :  { %v373_v59 = vpop.f32.mrb[2].mxu0 }
 0x32b   :  { %v374_v60 = vadd.f32 %v373_v59, %v306_v58  ;;  %v508_v61 = vpop.f32.mrb[3].mxu0 }
 0x32d   :  { %377 = vst [vmem:[#allocation8] sm:$0xff] %v374_v60 }
 0x32e   :  { %650 = shalt.err (!%p647_p0)
}
 0x32f   :  { %s651_s25 = scalar_lea.hbm %s782_s3, 128 }
 0x330   :  { %p652_p1 = scmp.ne.s32.totalorder %s782_s3, %s651_s25  ;;  %p655_p2 = scmp.lt.u32.totalorder %s651_s25, %s782_s3 }
 0x332   :  { %p657_p3 = pnand %p655_p2, %p652_p1 }
 0x334   :  { %660 = shalt.err (!%p657_p3)
}
 0x335   :  { %387 = dma.vmem_to_hbm [thread:$0]  %s385_s21, 128, %s782_s3, [#allocation4]  }
 0x336   :  { %665 = dma.done.wait [#allocation4], 128  }
 0x337   :  { %666 = vsyncadd [#allocation4], 4294967168 }
 0x338   :  { %391 = vsyncpa [#allocation3], 1 }
 0x339   :  { %392 = vsyncpa [#allocation6], 1 }
 0x33a   :  { %393 = vsyncpa [#allocation4], 1 }

</bundles_post_ra>
